<compile_context>
chip_gen: v7x
topology: tpu7x:2x2x1
jax: 0.10.0
libtpu: 0.0.40
codegen_flags: <defaults>
</compile_context>

<pallas_src>
import functools

import jax
import jax.numpy as jnp
from jax.experimental import pallas as pl
from jax.experimental.pallas import tpu as pltpu


def _mlp_kernel(x_ref, w_in_ref, b_in_ref, w_h_ref, b_h_ref,
                w_out_ref, b_out_ref, o_ref, *, n_hidden_layers, d_in):
    # x_ref:     (d_in, TILE_B)        -- batch on lanes
    # w_in_ref:  (N, d_in)             b_in_ref:  (N, 1)
    # w_h_ref:   (L, N, N)             b_h_ref:   (L, N, 1)
    # w_out_ref: (D_out, N)            b_out_ref: (D_out, 1)
    # o_ref:     (D_out, TILE_B)
    x = x_ref[...]  # (d_in, TILE_B), f32

    # Input layer on the VPU: h = sum_j w_in[:, j] (outer) x[j, :]
    # (d_in is tiny, a K=2 MXU contraction would be wasted work).
    h = w_in_ref[:, 0:1] * x[0:1, :]                       # (N, TILE_B)
    for j in range(1, d_in):
        h = h + w_in_ref[:, j:j + 1] * x[j:j + 1, :]
    h = jnp.tanh(h + b_in_ref[...])

    # Hidden layers on the MXU; biases are (N, 1) columns -> lane broadcast.
    for k in range(n_hidden_layers):
        h = jnp.dot(w_h_ref[k], h, preferred_element_type=jnp.float32)
        h = jnp.tanh(h + b_h_ref[k])

    # Output layer (no activation), lane-dense store.
    out = jnp.dot(w_out_ref[...], h, preferred_element_type=jnp.float32)
    o_ref[...] = (out + b_out_ref[...]).astype(o_ref.dtype)


def neural_net_forward(x, params, *, tile_b=512):
    """Forward pass of NeuralNet as a single Pallas kernel.

    x: (B, d_in) float32, same layout as the PyTorch module input.
    Returns (B, d_out).
    """
    w_in, b_in, w_h, b_h, w_out, b_out = params
    B, d_in = x.shape
    n_hidden, neurons, _ = w_h.shape
    d_out = w_out.shape[0]

    # Pad batch to a multiple of tile_b (handles arbitrary B), then transpose
    # to the batch-on-lanes layout expected by the kernel.
    n_tiles = pl.cdiv(B, tile_b)
    b_pad = n_tiles * tile_b
    if b_pad != B:
        x = jnp.pad(x, ((0, b_pad - B), (0, 0)))
    x_t = x.T  # (d_in, b_pad)

    kernel = functools.partial(_mlp_kernel,
                               n_hidden_layers=n_hidden, d_in=d_in)

    out_t = pl.pallas_call(
        kernel,
        out_shape=jax.ShapeDtypeStruct((d_out, b_pad), x.dtype),
        grid_spec=pltpu.PrefetchScalarGridSpec(
            num_scalar_prefetch=0,
            grid=(n_tiles,),
            in_specs=[
                pl.BlockSpec((d_in, tile_b), lambda i: (0, i)),           # x tile
                pl.BlockSpec((neurons, d_in), lambda i: (0, 0)),          # w_in
                pl.BlockSpec((neurons, 1), lambda i: (0, 0)),             # b_in
                pl.BlockSpec((n_hidden, neurons, neurons),
                             lambda i: (0, 0, 0)),                        # w_h
                pl.BlockSpec((n_hidden, neurons, 1), lambda i: (0, 0, 0)),# b_h
                pl.BlockSpec((d_out, neurons), lambda i: (0, 0)),         # w_out
                pl.BlockSpec((d_out, 1), lambda i: (0, 0)),               # b_out
            ],
            out_specs=pl.BlockSpec((d_out, tile_b), lambda i: (0, i)),
        ),
        compiler_params=pltpu.CompilerParams(
            dimension_semantics=("parallel",),      # shards batch tiles across TCs (v7x)
            vmem_limit_bytes=32 * 1024 * 1024,      # headroom; footprint here is ~MiB
        ),
    )(x_t, w_in, b_in, w_h, b_h, w_out, b_out)

    # Back to the PyTorch (B, d_out) layout, dropping batch padding.
    return out_t.T[:B]


def init_params(key, input_dimension, output_dimension, n_hidden_layers, neurons):
    """Deterministic parameter init.

    Weights are stored in the torch.nn.Linear layout (out_features, in_features);
    biases as (out_features, 1) columns (lane-broadcastable in the kernel).
    """
    ks = jax.random.split(key, 6)
    w_in = jax.random.normal(ks[0], (neurons, input_dimension), jnp.float32) * 0.5
    b_in = jax.random.normal(ks[1], (neurons, 1), jnp.float32) * 0.1
    w_h = jax.random.normal(ks[2], (n_hidden_layers, neurons, neurons),
                            jnp.float32) * (1.0 / jnp.sqrt(neurons))
    b_h = jax.random.normal(ks[3], (n_hidden_layers, neurons, 1), jnp.float32) * 0.1
    w_out = jax.random.normal(ks[4], (output_dimension, neurons),
                              jnp.float32) * (1.0 / jnp.sqrt(neurons))
    b_out = jax.random.normal(ks[5], (output_dimension, 1), jnp.float32) * 0.1
    return (w_in, b_in, w_h, b_h, w_out, b_out)


def reference_forward(x, params):
    """Pure-JAX reference matching the PyTorch forward semantics."""
    w_in, b_in, w_h, b_h, w_out, b_out = params
    hp = jax.lax.Precision.HIGHEST
    h = jnp.tanh(jnp.dot(x, w_in.T, precision=hp) + b_in[:, 0])
    for k in range(w_h.shape[0]):
        h = jnp.tanh(jnp.dot(h, w_h[k].T, precision=hp) + b_h[k, :, 0])
    return jnp.dot(h, w_out.T, precision=hp) + b_out[:, 0]


if __name__ == "__main__":
    # NeuralNet(input_dimension=2, output_dimension=1, n_hidden_layers=3, neurons=32)
    input_dimension = 2
    output_dimension = 1
    n_hidden_layers = 3
    neurons = 32
    batch = 512          # 2 grid steps of tile_b=256 -> both TCs busy on v7x
    tile_b = 256         # multiple of 256 (v6e/v7x MXU width); >=128 for v5e

    key = jax.random.PRNGKey(0)
    kx, kp = jax.random.split(key)
    x = jax.random.normal(kx, (batch, input_dimension), jnp.float32)
    params = init_params(kp, input_dimension, output_dimension,
                         n_hidden_layers, neurons)

    y = neural_net_forward(x, params, tile_b=tile_b)
    y = jax.block_until_ready(y)

    y_ref = reference_forward(x, params)
    assert y.shape == (batch, output_dimension)
    assert jnp.allclose(y, y_ref, atol=1e-4, rtol=1e-4), "mismatch vs reference"

    print("KERNEL_OK")
</pallas_src>

<mosaic_0001>
module attributes {stable_mosaic.version = 11 : i64} {
  func.func @_mlp_kernel(%arg0: i32, %arg1: memref<2x256xf32, #tpu.memory_space<vmem>>, %arg2: memref<32x2xf32, #tpu.memory_space<vmem>>, %arg3: memref<32x1xf32, #tpu.memory_space<vmem>>, %arg4: memref<3x32x32xf32, #tpu.memory_space<vmem>>, %arg5: memref<3x32x1xf32, #tpu.memory_space<vmem>>, %arg6: memref<1x32xf32, #tpu.memory_space<vmem>>, %arg7: memref<1x1xf32, #tpu.memory_space<vmem>>, %arg8: memref<1x256xf32, #tpu.memory_space<vmem>>) attributes {dimension_semantics = [#tpu.dimension_semantics<parallel>], iteration_bounds = array<i64: 2>, scalar_prefetch = 0 : i64, scratch_operands = 0 : i64, tpu.core_type = #tpu.core_type<tc>, window_params = [{transform_indices = @transform_0, window_bounds = array<i64: 2, 256>}, {pipeline_mode = #tpu.pipeline_mode<synchronous>, transform_indices = @transform_1, window_bounds = array<i64: 32, 2>}, {pipeline_mode = #tpu.pipeline_mode<synchronous>, transform_indices = @transform_2, window_bounds = array<i64: 32, 1>}, {pipeline_mode = #tpu.pipeline_mode<synchronous>, transform_indices = @transform_3, window_bounds = array<i64: 3, 32, 32>}, {pipeline_mode = #tpu.pipeline_mode<synchronous>, transform_indices = @transform_4, window_bounds = array<i64: 3, 32, 1>}, {pipeline_mode = #tpu.pipeline_mode<synchronous>, transform_indices = @transform_5, window_bounds = array<i64: 1, 32>}, {pipeline_mode = #tpu.pipeline_mode<synchronous>, transform_indices = @transform_6, window_bounds = array<i64: 1, 1>}, {transform_indices = @transform_7, window_bounds = array<i64: 1, 256>}]} {
    %c0 = arith.constant 0 : index
    %c0_0 = arith.constant 0 : index
    %0 = vector.load %arg1[%c0, %c0_0] : memref<2x256xf32, #tpu.memory_space<vmem>>, vector<2x256xf32>
    %c0_1 = arith.constant 0 : index
    %c0_2 = arith.constant 0 : index
    %1 = vector.load %arg2[%c0_1, %c0_2] : memref<32x2xf32, #tpu.memory_space<vmem>>, vector<32x1xf32>
    %2 = vector.extract_strided_slice %0 {offsets = [0, 0], sizes = [1, 256], strides = [1, 1]} : vector<2x256xf32> to vector<1x256xf32>
    %3 = vector.broadcast %1 : vector<32x1xf32> to vector<32x256xf32>
    %4 = vector.broadcast %2 : vector<1x256xf32> to vector<32x256xf32>
    %5 = arith.mulf %3, %4 : vector<32x256xf32>
    %c0_3 = arith.constant 0 : index
    %c1 = arith.constant 1 : index
    %6 = vector.load %arg2[%c0_3, %c1] : memref<32x2xf32, #tpu.memory_space<vmem>>, vector<32x1xf32>
    %7 = vector.extract_strided_slice %0 {offsets = [1, 0], sizes = [1, 256], strides = [1, 1]} : vector<2x256xf32> to vector<1x256xf32>
    %8 = vector.broadcast %6 : vector<32x1xf32> to vector<32x256xf32>
    %9 = vector.broadcast %7 : vector<1x256xf32> to vector<32x256xf32>
    %10 = arith.mulf %8, %9 : vector<32x256xf32>
    %11 = arith.addf %5, %10 : vector<32x256xf32>
    %c0_4 = arith.constant 0 : index
    %c0_5 = arith.constant 0 : index
    %12 = vector.load %arg3[%c0_4, %c0_5] : memref<32x1xf32, #tpu.memory_space<vmem>>, vector<32x1xf32>
    %13 = vector.broadcast %12 : vector<32x1xf32> to vector<32x256xf32>
    %14 = arith.addf %11, %13 : vector<32x256xf32>
    %15 = math.tanh %14 : vector<32x256xf32>
    %c0_6 = arith.constant 0 : index
    %c0_7 = arith.constant 0 : index
    %c0_8 = arith.constant 0 : index
    %16 = vector.load %arg4[%c0_6, %c0_7, %c0_8] : memref<3x32x32xf32, #tpu.memory_space<vmem>>, vector<1x32x32xf32>
    %17 = vector.shape_cast %16 : vector<1x32x32xf32> to vector<32x32xf32>
    %cst = arith.constant dense<0.000000e+00> : vector<32x256xf32>
    %18 = tpu.matmul %17, %15, %cst {dimension_numbers = #tpu.dot_dimension_numbers<[1], [0], [0], [1], [0, 0, 1, 1], [], []>} : vector<32x32xf32>, vector<32x256xf32>, vector<32x256xf32> -> vector<32x256xf32>
    %c0_9 = arith.constant 0 : index
    %c0_10 = arith.constant 0 : index
    %c0_11 = arith.constant 0 : index
    %19 = vector.load %arg5[%c0_9, %c0_10, %c0_11] : memref<3x32x1xf32, #tpu.memory_space<vmem>>, vector<1x32x1xf32>
    %20 = vector.shape_cast %19 : vector<1x32x1xf32> to vector<32x1xf32>
    %21 = vector.broadcast %20 : vector<32x1xf32> to vector<32x256xf32>
    %22 = arith.addf %18, %21 : vector<32x256xf32>
    %23 = math.tanh %22 : vector<32x256xf32>
    %c1_12 = arith.constant 1 : index
    %c0_13 = arith.constant 0 : index
    %c0_14 = arith.constant 0 : index
    %24 = vector.load %arg4[%c1_12, %c0_13, %c0_14] : memref<3x32x32xf32, #tpu.memory_space<vmem>>, vector<1x32x32xf32>
    %25 = vector.shape_cast %24 : vector<1x32x32xf32> to vector<32x32xf32>
    %cst_15 = arith.constant dense<0.000000e+00> : vector<32x256xf32>
    %26 = tpu.matmul %25, %23, %cst_15 {dimension_numbers = #tpu.dot_dimension_numbers<[1], [0], [0], [1], [0, 0, 1, 1], [], []>} : vector<32x32xf32>, vector<32x256xf32>, vector<32x256xf32> -> vector<32x256xf32>
    %c1_16 = arith.constant 1 : index
    %c0_17 = arith.constant 0 : index
    %c0_18 = arith.constant 0 : index
    %27 = vector.load %arg5[%c1_16, %c0_17, %c0_18] : memref<3x32x1xf32, #tpu.memory_space<vmem>>, vector<1x32x1xf32>
    %28 = vector.shape_cast %27 : vector<1x32x1xf32> to vector<32x1xf32>
    %29 = vector.broadcast %28 : vector<32x1xf32> to vector<32x256xf32>
    %30 = arith.addf %26, %29 : vector<32x256xf32>
    %31 = math.tanh %30 : vector<32x256xf32>
    %c2 = arith.constant 2 : index
    %c0_19 = arith.constant 0 : index
    %c0_20 = arith.constant 0 : index
    %32 = vector.load %arg4[%c2, %c0_19, %c0_20] : memref<3x32x32xf32, #tpu.memory_space<vmem>>, vector<1x32x32xf32>
    %33 = vector.shape_cast %32 : vector<1x32x32xf32> to vector<32x32xf32>
    %cst_21 = arith.constant dense<0.000000e+00> : vector<32x256xf32>
    %34 = tpu.matmul %33, %31, %cst_21 {dimension_numbers = #tpu.dot_dimension_numbers<[1], [0], [0], [1], [0, 0, 1, 1], [], []>} : vector<32x32xf32>, vector<32x256xf32>, vector<32x256xf32> -> vector<32x256xf32>
    %c2_22 = arith.constant 2 : index
    %c0_23 = arith.constant 0 : index
    %c0_24 = arith.constant 0 : index
    %35 = vector.load %arg5[%c2_22, %c0_23, %c0_24] : memref<3x32x1xf32, #tpu.memory_space<vmem>>, vector<1x32x1xf32>
    %36 = vector.shape_cast %35 : vector<1x32x1xf32> to vector<32x1xf32>
    %37 = vector.broadcast %36 : vector<32x1xf32> to vector<32x256xf32>
    %38 = arith.addf %34, %37 : vector<32x256xf32>
    %39 = math.tanh %38 : vector<32x256xf32>
    %c0_25 = arith.constant 0 : index
    %c0_26 = arith.constant 0 : index
    %40 = vector.load %arg6[%c0_25, %c0_26] : memref<1x32xf32, #tpu.memory_space<vmem>>, vector<1x32xf32>
    %cst_27 = arith.constant dense<0.000000e+00> : vector<1x256xf32>
    %41 = tpu.matmul %40, %39, %cst_27 {dimension_numbers = #tpu.dot_dimension_numbers<[1], [0], [0], [1], [0, 0, 1, 1], [], []>} : vector<1x32xf32>, vector<32x256xf32>, vector<1x256xf32> -> vector<1x256xf32>
    %c0_28 = arith.constant 0 : index
    %c0_29 = arith.constant 0 : index
    %42 = vector.load %arg7[%c0_28, %c0_29] : memref<1x1xf32, #tpu.memory_space<vmem>>, vector<1x1xf32>
    %43 = vector.broadcast %42 : vector<1x1xf32> to vector<1x256xf32>
    %44 = arith.addf %41, %43 : vector<1x256xf32>
    %c0_30 = arith.constant 0 : index
    %c0_31 = arith.constant 0 : index
    %45 = vector.load %arg8[%c0_30, %c0_31] : memref<1x256xf32, #tpu.memory_space<vmem>>, vector<1x256xf32>
    tpu.vector_store %arg8[%c0_30, %c0_31], %44 {strides = array<i32>} : memref<1x256xf32, #tpu.memory_space<vmem>>, vector<1x256xf32>,
    return
  }
  func.func @transform_0(%arg0: i32) -> (i32, i32) {
    %c0_i32 = arith.constant 0 : i32
    %c0_i32_0 = arith.constant 0 : i32
    return %c0_i32, %arg0 : i32, i32
  }
  func.func @transform_1(%arg0: i32) -> (i32, i32) {
    %c0_i32 = arith.constant 0 : i32
    %c0_i32_0 = arith.constant 0 : i32
    %c0_i32_1 = arith.constant 0 : i32
    return %c0_i32, %c0_i32_0 : i32, i32
  }
  func.func @transform_2(%arg0: i32) -> (i32, i32) {
    %c0_i32 = arith.constant 0 : i32
    %c0_i32_0 = arith.constant 0 : i32
    %c0_i32_1 = arith.constant 0 : i32
    return %c0_i32, %c0_i32_0 : i32, i32
  }
  func.func @transform_3(%arg0: i32) -> (i32, i32, i32) {
    %c0_i32 = arith.constant 0 : i32
    %c0_i32_0 = arith.constant 0 : i32
    %c0_i32_1 = arith.constant 0 : i32
    %c0_i32_2 = arith.constant 0 : i32
    return %c0_i32, %c0_i32_0, %c0_i32_1 : i32, i32, i32
  }
  func.func @transform_4(%arg0: i32) -> (i32, i32, i32) {
    %c0_i32 = arith.constant 0 : i32
    %c0_i32_0 = arith.constant 0 : i32
    %c0_i32_1 = arith.constant 0 : i32
    %c0_i32_2 = arith.constant 0 : i32
    return %c0_i32, %c0_i32_0, %c0_i32_1 : i32, i32, i32
  }
  func.func @transform_5(%arg0: i32) -> (i32, i32) {
    %c0_i32 = arith.constant 0 : i32
    %c0_i32_0 = arith.constant 0 : i32
    %c0_i32_1 = arith.constant 0 : i32
    return %c0_i32, %c0_i32_0 : i32, i32
  }
  func.func @transform_6(%arg0: i32) -> (i32, i32) {
    %c0_i32 = arith.constant 0 : i32
    %c0_i32_0 = arith.constant 0 : i32
    %c0_i32_1 = arith.constant 0 : i32
    return %c0_i32, %c0_i32_0 : i32, i32
  }
  func.func @transform_7(%arg0: i32) -> (i32, i32) {
    %c0_i32 = arith.constant 0 : i32
    %c0_i32_0 = arith.constant 0 : i32
    return %c0_i32, %arg0 : i32, i32
  }
}

</mosaic_0001>

<bundles_post_ra>
// kernel: tpu_custom_call.1
= control target key start
LH: loop header
LB: loop body
LE: loop exit
PB: predicated region body
PF: predicated region fallthrough
CT: control target
= control target key end

     0   :  { %s1564_s0 = inlined_call_operand.vmem [shape: f32[2,512], index: 0, kind: input, shape index: {}]   ;;  %s1565_s1 = inlined_call_operand.vmem [shape: f32[32,2], index: 1, kind: input, shape index: {}]   ;;  %s1566_s2 = inlined_call_operand.vmem [shape: f32[32,1], index: 2, kind: input, shape index: {}]   ;;  %s1567_s3 = inlined_call_operand.vmem [shape: f32[3,32,32], index: 3, kind: input, shape index: {}]   ;;  %s1568_s4 = inlined_call_operand.vmem [shape: f32[3,32,1], index: 4, kind: input, shape index: {}]   ;;  %s1569_s5 = inlined_call_operand.vmem [shape: f32[1,32], index: 5, kind: input, shape index: {}]   ;;  %s1570_s6 = inlined_call_operand.<no memory space> [shape: f32[1,1], index: 6, kind: input, shape index: {}]   ;;  %s1571_s7 = inlined_call_operand.hbm [shape: f32[1,512], index: 7, kind: output, shape index: {}]  }
   0x1   :  { %v12_v0 = vstv %s1570_s6 }
   0x2   :  { %13 = vst [vmem:[#allocation2] sm:$0x1] %v12_v0 }
   0x3   :  { %14 = vsyncpa [#allocation4], 0 }
   0x4   :  { %16 = vsyncpa [#allocation4 + $0x1], 0  ;;  %s1325_s26 = smov 0   ;;  %s1327_s27 = smov 0  }
   0x5   :  { %s1329_s28 = smov 0   ;;  %s1331_s29 = smov 0  }
   0x6 LB: > { %s1346_s6 = sadd.s32 4294967295, %s1275_s29   ;;  %s1022_s30 = sadd.s32 4294967294, %s1275_s29   ;;  %s1275_s29 = sphi %s1331_s29, %s1577_s29   ;;  %s1271_s28 = sphi %s1329_s28, %s1576_s28   ;;  %s1267_s27 = sphi %s1327_s27, %s1575_s27   ;;  %s1263_s26 = sphi %s1325_s26, %s1574_s26  }
   0x7   : > { %s1350_s8 = sadd.s32 1, %s1275_s29   ;;  %s181_s9 = sadd.s32 1, %s1271_s28 }
   0x8   : > { %s178_s10 = ssub.s32 %s1275_s29, %s1350_s8  ;;  %p191_p0 = scmp.ne.s32.totalorder %s1271_s28, %s1267_s27 }
   0x9   : > { %p179_p1 = scmp.eq.s32.totalorder %s178_s10, 0  ;;  %p192_p2 = scmp.eq.s32.totalorder %s1346_s6, 1 }
   0xa   : > { %p197_p3 = scmp.ne.s32.totalorder %s1267_s27, %s1263_s26  ;;  %p198_p4 = scmp.eq.s32.totalorder %s1022_s30, 1 }
   0xb   : > { %s1361_s11 = scalar_select %p179_p1, %s1271_s28, %s181_s9  }
   0xc   : > { %p1363_p5 = por %p192_p2, %p191_p0  ;;  %p1367_p6 = por %p198_p4, %p197_p3 }
   0xd   : > { %p1025_p7 = scmp.ge.s32.totalorder %s1275_s29, 1  ;;  %p243_p8 = scmp.lt.s32.totalorder %s1275_s29, 3 }
   0xf   : > { %p244_p9 = pnand %p1025_p7, %p243_p8 }
  0x10   : > { %v285_v1 = vld [vmem:[%s1565_s1 + $0x10] sm:$0xff] (!%p244_p9)  ;;  %v283_v2 = vld [vmem:[%s1565_s1] sm:$0xff] (!%p244_p9)  ;;  %v1277_v3 = vmov (!%p244_p9), 1   ;;  %v284_v4 = vld [vmem:[%s1565_s1 + $0x8] sm:$0xff] (!%p244_p9)  ;;  %v1278_v5 = vmov (!%p244_p9), 0   ;;  %v1279_v23 = vmov (!%p244_p9), 0.0   ;;  %v308_v25 = vlaneseq (!%p244_p9) }
  0x11   : > { %247 = sbr.rel (%p244_p9) target bundleno = 1157 (0x485), region = 48  ;;  %1145 = vset.pattern.permute.xlu0 (!%p244_p9), %v1277_v3  ;;  %1143 = vset.pattern.permute.xlu1 (!%p244_p9), %v1277_v3  ;;  %v286_v6 = vld [vmem:[%s1565_s1 + $0x18] sm:$0xff] (!%p244_p9)  ;;  %v385_v7 = vld [vmem:[%s1566_s2 + $0x8] sm:$0xff] (!%p244_p9)  ;;  %v384_v8 = vld [vmem:[%s1566_s2] sm:$0xff] (!%p244_p9)  ;;  %s1027_s24 = sshll.u32 (!%p244_p9), %s1346_s6, 1  ;;  %vm452_vm0 = vcmask (!%p244_p9), 261120  }
  0x12   : > { %343 = vperm.xlu0 (!%p244_p9), %1145, %v285_v1   ;;  %335 = vperm.xlu1 (!%p244_p9), %1143, %v283_v2   ;;  %v428_v9 = vld [vmem:[%s1568_s4] sm:$0xff] (!%p244_p9)  ;;  %v386_v10 = vld [vmem:[%s1566_s2 + $0x10] sm:$0xff] (!%p244_p9)  ;;  %v387_v12 = vld [vmem:[%s1566_s2 + $0x18] sm:$0xff] (!%p244_p9)  ;;  %p276_p10 = scmp.lt.s32.totalorder (!%p244_p9), %s1027_s24, 3  ;;  %v1437_v26 = vshrl.u32 (!%p244_p9), %v308_v25, 7  ;;  %s1063_s9 = sshll.u32 (!%p244_p9), %s1346_s6, 5 }
  0x13   : > { %v430_v11 = vld [vmem:[%s1568_s4 + $0x10] sm:$0xff] (!%p244_p9)  ;;  %v1037_v13 = vld [vmem:[%s1568_s4 + $0x20] sm:$0xff] (!%p244_p9)  ;;  %v429_v14 = vld [vmem:[%s1568_s4 + $0x8] sm:$0xff] (!%p244_p9)  ;;  %529 = vmatprep.mubr.f32.mxu0 (!%p244_p9), %v1279_v23  ;;  %541 = vmatprep.mubr.f32.mxu1 (!%p244_p9), %v1279_v23  ;;  %vm945_vm1 = vcmp.lt.s32.totalorder (!%p244_p9), %v308_v25, 256  ;;  %s1522_s17 = scalar_lea.hbm (!%p244_p9), %s1571_s7, %s1063_s9  ;;  %s1281_s6 = smov (!%p244_p9), [#allocation3]  }
  0x14   : > { %v1039_v15 = vld [vmem:[%s1568_s4 + $0x30] sm:$0xff] (!%p244_p9)  ;;  %v431_v16 = vld [vmem:[%s1568_s4 + $0x18] sm:$0xff] (!%p244_p9)  ;;  %v1049_v17 = vld [vmem:[%s1568_s4 + $0x40] sm:$0xff] (!%p244_p9)  ;;  %v1443_v29 = vsub.s32 (!%p244_p9), 0, %v1437_v26  ;;  %v314_v30 = vsub.s32 (!%p244_p9), 2, %v1437_v26  ;;  %v352_v31 = vsub.s32 (!%p244_p9), 1, %v1437_v26 }
  0x15   : > { %v1038_v18 = vld [vmem:[%s1568_s4 + $0x28] sm:$0xff] (!%p244_p9)  ;;  %v1051_v19 = vld [vmem:[%s1568_s4 + $0x50] sm:$0xff] (!%p244_p9)  ;;  %v1040_v20 = vld [vmem:[%s1568_s4 + $0x38] sm:$0xff] (!%p244_p9)  ;;  %v356_v32 = vsub.s32 (!%p244_p9), 3, %v1437_v26  ;;  %s1217_s20 = sshll.u32 (!%p244_p9), %s1281_s6, 4  ;;  %s1218_s20 = int_to_ptr.vmem [resolvable:$false] %s1217_s20 }
  0x16   : > { %1146 = vset.pattern.permute.xlu0 (!%p244_p9), %v1278_v5  ;;  %339 = vperm.xlu1 (!%p244_p9), %1143, %v284_v4   ;;  %v841_v21 = vld [vmem:[#allocation2] sm:$0x1] (!%p244_p9)  ;;  %v1050_v22 = vld [vmem:[%s1568_s4 + $0x48] sm:$0xff] (!%p244_p9)  ;;  %v1052_v24 = vld [vmem:[%s1568_s4 + $0x58] sm:$0xff] (!%p244_p9)  ;;  %s1219_s21 = scalar_lea.vmem (!%p244_p9), %s1218_s20, 64 }
  0x17   : > { %289 = vperm.xlu0 (!%p244_p9), %1146, %v283_v2  }
  0x18   : > { %s1579_s24 = smov (!%p276_p10, %s1027_s24), 3 }
  0x19   : > { %s1028_s25 = sshll.u32 %s1579_s24, 1 }
  0x1a   : > { %1144 = vset.pattern.permute.xlu1 %v1278_v5  ;;  %s279_s10 = scalar_lea.vmem %s1564_s0, %s1028_s25  ;;  %s272_s25 = sand.u32 1, %s1267_s27  }
  0x1b   : > { %294 = vperm.xlu0 %1146, %v284_v4   ;;  %304 = vperm.xlu1 %1144, %v286_v6   ;;  %v282_v33 = vld [vmem:[%s279_s10] sm:$0xf]  ;;  %s1026_s30 = sshll.u32 %s272_s25, 1  ;;  %s949_s18 = scalar_lea.sflag [#allocation4], %s272_s25 }
  0x1c   : > { %v311_v36 = vrot.slane %v282_v33, %v1443_v29  ;;  %v315_v37 = vrot.slane %v282_v33, %v314_v30  ;;  %v353_v38 = vrot.slane %v282_v33, %v352_v31  ;;  %v357_v39 = vrot.slane %v282_v33, %v356_v32  ;;  %s274_s10 = scalar_lea.vmem [#allocation3], %s1026_s30 }
  0x1d   : > { %s963_s14 = sshll.u32 %s274_s10, 4  ;;  %s1524_s14 = int_to_ptr.vmem [resolvable:$true] %s963_s14 }
  0x1e   : > { %v321_v40 = vrot.slane %v311_v36, %v1443_v29  ;;  %v325_v43 = vrot.slane %v315_v37, %v1443_v29  ;;  %v363_v44 = vrot.slane %v353_v38, %v352_v31  ;;  %v367_v45 = vrot.slane %v357_v39, %v352_v31  ;;  %v424_v36 = vld [vmem:[%s1567_s3] sm:$0xff]  ;;  %v426_v37 = vld [vmem:[%s1567_s3 + $0x10] sm:$0xff]  ;;  %v425_v38 = vld [vmem:[%s1567_s3 + $0x8] sm:$0xff]  ;;  %s1213_s19 = scalar_lea.vmem %s1524_s14, 32  ;;  %p1220_p0 = scmp.lt.s32.totalorder %s1524_s14, %s1218_s20 }
  0x1f   : > { %299 = vperm.xlu0 %1146, %v285_v1   ;;  %1147 = vset.pattern.permute.xlu1 %v1277_v3  ;;  %v427_v39 = vld [vmem:[%s1567_s3 + $0x18] sm:$0xff]  ;;  %p1214_p11 = scmp.ne.s32.totalorder %s1524_s14, %s1213_s19  ;;  %p1221_p1 = scmp.lt.s32.totalorder %s1219_s21, %s1213_s19 }
  0x20   : > { %347 = vperm.xlu1 %1147, %v286_v6  }
  0x21   : > { %p1215_p12 = pnand %p1214_p11, %p1363_p5  ;;  %p1222_p2 = por %p1221_p1, %p1220_p0 }
  0x23   : > { %395 = vperm.xlu0 %1146, %v385_v7   ;;  %p1216_p13 = pneg %p1215_p12 }
  0x24   : > { %1148 = vset.pattern.permute.xlu1 %v1278_v5 }
  0x25   : > { %390 = vperm.xlu1 %1148, %v384_v8   ;;  %p1223_p3 = pnand %p1222_p2, %p1216_p13 }
  0x27   : > { %434 = vperm.xlu0 %1146, %v428_v9  }
  0x29   : > { %400 = vperm.xlu1 %1148, %v386_v10  }
  0x2b   : > { %444 = vperm.xlu0 %1146, %v430_v11  }
  0x2d   : > { %405 = vperm.xlu1 %1148, %v387_v12  }
  0x2f   : > { %574 = vperm.xlu0 %1146, %v1037_v13  }
  0x31   : > { %439 = vperm.xlu1 %1148, %v429_v14  }
  0x33   : > { %584 = vperm.xlu0 %1146, %v1039_v15  }
  0x35   : > { %449 = vperm.xlu1 %1148, %v431_v16  }
  0x37   : > { %713 = vperm.xlu0 %1146, %v1049_v17  }
  0x39   : > { %579 = vperm.xlu1 %1148, %v1038_v18  }
  0x3b   : > { %723 = vperm.xlu0 %1146, %v1051_v19  }
  0x3d   : > { %589 = vperm.xlu1 %1148, %v1040_v20  }
  0x3f   : > { %844 = vperm.xlu0 %1146, %v841_v21  }
  0x41   : > { %718 = vperm.xlu1 %1148, %v1050_v22  }
  0x45   : > { %728 = vperm.xlu1 %1148, %v1052_v24  }
  0x91   : > { %v336_v27 = vpop.permute.xlu1 %335  ;;  %v344_v28 = vpop.permute.xlu0 %343 }
  0x92   : > { %v368_v54 = vmul.f32 %v363_v44, %v336_v27  ;;  %v369_v55 = vmul.f32 %v367_v45, %v336_v27  ;;  %v372_v2 = vmul.f32 %v363_v44, %v344_v28  ;;  %v373_v5 = vmul.f32 %v367_v45, %v344_v28 }
  0x95   : > { %v340_v34 = vpop.permute.xlu1 %339 }
  0x96   : > { %v290_v35 = vpop.permute.xlu0 %289  ;;  %v370_v50 = vmul.f32 %v363_v44, %v340_v34  ;;  %v371_v51 = vmul.f32 %v367_v45, %v340_v34 }
  0x97   : > { %v326_v48 = vmul.f32 %v321_v40, %v290_v35  ;;  %v327_v52 = vmul.f32 %v325_v43, %v290_v35 }
  0x99   : > { %v376_v59 = vadd.f32 %v368_v54, %v326_v48  ;;  %v377_v63 = vadd.f32 %v369_v55, %v327_v52 }
  0x9a   : > { %v295_v41 = vpop.permute.xlu0 %294  ;;  %v305_v42 = vpop.permute.xlu1 %304 }
  0x9b   : > { %v328_v46 = vmul.f32 %v321_v40, %v295_v41  ;;  %v329_v47 = vmul.f32 %v325_v43, %v295_v41  ;;  %v332_v11 = vmul.f32 %v321_v40, %v305_v42  ;;  %v333_v12 = vmul.f32 %v325_v43, %v305_v42 }
  0x9d   : > { %v378_v56 = vadd.f32 %v370_v50, %v328_v46  ;;  %v379_v57 = vadd.f32 %v371_v51, %v329_v47 }
  0x9e   : > { %v300_v49 = vpop.permute.xlu0 %299 }
  0x9f   : > { %v348_v53 = vpop.permute.xlu1 %347  ;;  %v330_v60 = vmul.f32 %v321_v40, %v300_v49  ;;  %v331_v0 = vmul.f32 %v325_v43, %v300_v49 }
  0xa0   : > { %v374_v6 = vmul.f32 %v363_v44, %v348_v53  ;;  %v375_v7 = vmul.f32 %v367_v45, %v348_v53 }
  0xa1   : > { %v380_v8 = vadd.f32 %v372_v2, %v330_v60  ;;  %v381_v10 = vadd.f32 %v373_v5, %v331_v0 }
  0xa2   : > { %v396_v58 = vpop.permute.xlu0 %395  ;;  %v382_v15 = vadd.f32 %v374_v6, %v332_v11  ;;  %v383_v16 = vadd.f32 %v375_v7, %v333_v12  ;;  %v1036_v11 = vld [vmem:[%s1567_s3 + $0x38] sm:$0xff] }
  0xa3   : > { %v410_v61 = vadd.f32 %v396_v58, %v378_v56  ;;  %v411_v62 = vadd.f32 %v396_v58, %v379_v57 }
  0xa4   : > { %v391_v1 = vpop.permute.xlu1 %390 }
  0xa5   : > { %1149 = vtanh.f32 %v410_v61  ;;  %v408_v3 = vadd.f32 %v391_v1, %v376_v59  ;;  %v409_v4 = vadd.f32 %v391_v1, %v377_v63 }
  0xa6   : > { %1151 = vtanh.f32 %v411_v62  ;;  %v435_v40 = vpop.permute.xlu0 %434 }
  0xa7   : > { %1153 = vtanh.f32 %v408_v3 }
  0xa8   : > { %1155 = vtanh.f32 %v409_v4  ;;  %v401_v9 = vpop.permute.xlu1 %400 }
  0xa9   : > { %v412_v13 = vadd.f32 %v401_v9, %v380_v8  ;;  %v413_v14 = vadd.f32 %v401_v9, %v381_v10  ;;  %v1033_v8 = vld [vmem:[%s1567_s3 + $0x20] sm:$0xff]  ;;  %v1034_v9 = vld [vmem:[%s1567_s3 + $0x28] sm:$0xff]  ;;  %v1035_v10 = vld [vmem:[%s1567_s3 + $0x30] sm:$0xff] }
  0xaa   : > { %v445_v42 = vpop.permute.xlu0 %444 }
  0xab   : > { %1157 = vtanh.f32 %v412_v13 }
  0xac   : > { %v406_v17 = vpop.permute.xlu1 %405  ;;  %1159 = vtanh.f32 %v413_v14 }
  0xad   : > { %v414_v18 = vadd.f32 %v406_v17, %v382_v15  ;;  %v415_v19 = vadd.f32 %v406_v17, %v383_v16 }
  0xae   : > { %v575_v12 = vpop.permute.xlu0 %574 }
  0xaf   : > { %v1150_v20 = vpop.eup %1149  ;;  %1161 = vtanh.f32 %v414_v18 }
  0xb0   : > { %v1152_v21 = vpop.eup %1151  ;;  %1163 = vtanh.f32 %v415_v19  ;;  %v440_v41 = vpop.permute.xlu1 %439 }
  0xb1   : > { %v1154_v22 = vpop.eup %1153 }
  0xb2   : > { %v1156_v24 = vpop.eup %1155  ;;  %v1066_v27 = vpack.c.bf16 %v1150_v20, %v1154_v22  ;;  %v585_v22 = vpop.permute.xlu0 %584 }
  0xb3   : > { %v1064_v28 = vpack.c.bf16 %v1152_v21, %v1156_v24 }
  0xb4   : > { %v450_v51 = vpop.permute.xlu1 %449 }
  0xb5   : > { %1065 = vmatprep.subr.bf16.mxu0 %v1064_v28  ;;  %1096 = vmatprep.subr.bf16.mxu1 %v1064_v28  ;;  %v1158_v30 = vpop.eup %1157 }
  0xb6   : > { %1067 = vmatpush1.bf16.msra.mxu0 %v1066_v27  ;;  %1098 = vmatpush1.bf16.msra.mxu1 %v1066_v27  ;;  %v1160_v31 = vpop.eup %1159 }
  0xb8   : > { %v580_v17 = vpop.permute.xlu1 %579 }
  0xb9   : > { %v1162_v32 = vpop.eup %1161 }
  0xba   : > { %v1164_v33 = vpop.eup %1163  ;;  %v1070_v34 = vpack.c.bf16 %v1162_v32, %v1158_v30 }
  0xbb   : > { %v1068_v35 = vpack.c.bf16 %v1164_v33, %v1160_v31 }
  0xbc   : > { %v590_v31 = vpop.permute.xlu1 %589 }
  0xbd   : > { %1069 = vmatprep.subr.bf16.mxu0 %v1068_v35  ;;  %1097 = vmatprep.subr.bf16.mxu1 %v1068_v35 }
  0xbe   : > { %1071 = vmatpush1.bf16.msra.mxu0 %v1070_v34  ;;  %1099 = vmatpush1.bf16.msra.mxu1 %v1070_v34 }
  0xc1   : > { %1029 = vmatmul.mubr.msk.f32.vlgmr.msra.gmra.mrb[0].mxu0 %vm452_vm0, %v424_v36  ;;  %1031 = vmatmul.mubr.msk.f32.vlgmr.msra.gmra.mrb[0].mxu1 %vm452_vm0, %v426_v37 }
  0xc2   : > { %535 = vmatprep.mubr.f32.mxu0 %v1279_v23  ;;  %547 = vmatprep.mubr.f32.mxu1 %v1279_v23 }
  0xc5   : > { %1030 = vmatmul.mubr.msk.f32.gmra.mrb[2].mxu0 %vm452_vm0, %v425_v38  ;;  %1032 = vmatmul.mubr.msk.f32.gmra.mrb[2].mxu1 %vm452_vm0, %v427_v39 }
  0xc6   : > { %668 = vmatprep.mubr.f32.mxu1 %v1279_v23  ;;  %807 = vmatprep.mubr.f32.mxu0 %v1279_v23 }
 0x194   : > { %v531_v43 = vpop.f32.mrb[0].mxu0  ;;  %v543_v44 = vpop.f32.mrb[0].mxu1 }
 0x195   : > { %v532_v45 = vadd.f32 %v531_v43, %v435_v40  ;;  %v544_v46 = vadd.f32 %v543_v44, %v445_v42  ;;  %v533_v47 = vpop.f32.mrb[1].mxu0  ;;  %v545_v48 = vpop.f32.mrb[1].mxu1 }
 0x196   : > { %v534_v49 = vadd.f32 %v533_v47, %v435_v40  ;;  %v546_v50 = vadd.f32 %v545_v48, %v445_v42  ;;  %v1045_v48 = vld [vmem:[%s1567_s3 + $0x40] sm:$0xff] }
 0x197   : > { %1165 = vtanh.f32 %v532_v45 }
 0x198   : > { %1167 = vtanh.f32 %v544_v46  ;;  %v537_v52 = vpop.f32.mrb[2].mxu0  ;;  %v549_v53 = vpop.f32.mrb[2].mxu1 }
 0x199   : > { %1169 = vtanh.f32 %v534_v49  ;;  %v538_v54 = vadd.f32 %v537_v52, %v440_v41  ;;  %v550_v55 = vadd.f32 %v549_v53, %v450_v51  ;;  %v539_v56 = vpop.f32.mrb[3].mxu0  ;;  %v551_v57 = vpop.f32.mrb[3].mxu1  ;;  %v1046_v49 = vld [vmem:[%s1567_s3 + $0x48] sm:$0xff] }
 0x19a   : > { %1171 = vtanh.f32 %v546_v50  ;;  %v540_v58 = vadd.f32 %v539_v56, %v440_v41  ;;  %v552_v59 = vadd.f32 %v551_v57, %v450_v51  ;;  %v1047_v50 = vld [vmem:[%s1567_s3 + $0x50] sm:$0xff]  ;;  %v1048_v51 = vld [vmem:[%s1567_s3 + $0x58] sm:$0xff]  ;;  %v714_v52 = vpop.permute.xlu0 %713  ;;  %v719_v57 = vpop.permute.xlu1 %718 }
 0x19b   : > { %1173 = vtanh.f32 %v538_v54 }
 0x19c   : > { %1175 = vtanh.f32 %v550_v55 }
 0x19d   : > { %1177 = vtanh.f32 %v540_v58 }
 0x19e   : > { %1179 = vtanh.f32 %v552_v59 }
 0x1a1   : > { %v1166_v60 = vpop.eup %1165 }
 0x1a2   : > { %v1168_v61 = vpop.eup %1167 }
 0x1a3   : > { %v1170_v62 = vpop.eup %1169 }
 0x1a4   : > { %v1172_v63 = vpop.eup %1171 }
 0x1a5   : > { %v1174_v0 = vpop.eup %1173 }
 0x1a6   : > { %v1176_v1 = vpop.eup %1175  ;;  %v1074_v2 = vpack.c.bf16 %v1174_v0, %v1166_v60 }
 0x1a7   : > { %v1178_v3 = vpop.eup %1177  ;;  %v1078_v4 = vpack.c.bf16 %v1176_v1, %v1168_v61 }
 0x1a8   : > { %v1180_v5 = vpop.eup %1179  ;;  %v1072_v6 = vpack.c.bf16 %v1178_v3, %v1170_v62 }
 0x1a9   : > { %v1076_v7 = vpack.c.bf16 %v1180_v5, %v1172_v63 }
 0x1aa   : > { %1073 = vmatprep.subr.bf16.mxu1 %v1072_v6 }
 0x1ab   : > { %1075 = vmatpush1.bf16.msra.mxu1 %v1074_v2  ;;  %v729_v2 = vpop.permute.xlu1 %728 }
 0x1ac   : > { %1077 = vmatprep.subr.bf16.mxu1 %v1076_v7 }
 0x1af   : > { %1079 = vmatpush1.bf16.msra.mxu1 %v1078_v4 }
 0x1b2   : > { %1041 = vmatmul.mubr.msk.f32.vlgmr.msra.gmra.mrb[4].mxu1 %vm452_vm0, %v1033_v8 }
 0x1b3   : > { %674 = vmatprep.mubr.f32.mxu1 %v1279_v23 }
 0x1b6   : > { %1042 = vmatmul.mubr.msk.f32.gmra.mrb[6].mxu1 %vm452_vm0, %v1034_v9 }
 0x1b7   : > { %680 = vmatprep.mubr.f32.mxu1 %v1279_v23 }
 0x1ba   : > { %1043 = vmatmul.mubr.msk.f32.gmra.mrb[8].mxu1 %vm452_vm0, %v1035_v10 }
 0x1bb   : > { %686 = vmatprep.mubr.f32.mxu1 %v1279_v23 }
 0x1be   : > { %1044 = vmatmul.mubr.msk.f32.gmra.mrb[10].mxu1 %vm452_vm0, %v1036_v11 }
 0x1bf   : > { %918 = vmatprep.mubr.f32.mxu1 %v1279_v23 }
 0x285   : > { %v670_v13 = vpop.f32.mrb[4].mxu1 }
 0x286   : > { %v671_v14 = vadd.f32 %v670_v13, %v575_v12  ;;  %v672_v15 = vpop.f32.mrb[5].mxu1 }
 0x287   : > { %v673_v16 = vadd.f32 %v672_v15, %v575_v12 }
 0x288   : > { %1181 = vtanh.f32 %v671_v14 }
 0x289   : > { %v676_v18 = vpop.f32.mrb[6].mxu1  ;;  %1183 = vtanh.f32 %v673_v16 }
 0x28a   : > { %v677_v19 = vadd.f32 %v676_v18, %v580_v17  ;;  %v678_v20 = vpop.f32.mrb[7].mxu1 }
 0x28b   : > { %v679_v21 = vadd.f32 %v678_v20, %v580_v17  ;;  %v1280_v20 = vmov 1966171168  }
 0x28c   : > { %1185 = vtanh.f32 %v677_v19  ;;  %v840_v19 = vld [vmem:[%s1569_s5] sm:$0x1] }
 0x28d   : > { %1187 = vtanh.f32 %v679_v21  ;;  %v682_v24 = vpop.f32.mrb[8].mxu1  ;;  %v929_v21 = vunpack.c.l.s4 %v1280_v20 }
 0x28e   : > { %v683_v27 = vadd.f32 %v682_v24, %v585_v22  ;;  %v684_v28 = vpop.f32.mrb[9].mxu1 }
 0x28f   : > { %v685_v30 = vadd.f32 %v684_v28, %v585_v22  ;;  %v930_v24 = vunpack.c.0.s8 %v929_v21 }
 0x290   : > { %1189 = vtanh.f32 %v683_v27 }
 0x291   : > { %v688_v32 = vpop.f32.mrb[10].mxu1  ;;  %1191 = vtanh.f32 %v685_v30 }
 0x292   : > { %v689_v33 = vadd.f32 %v688_v32, %v590_v31  ;;  %v690_v34 = vpop.f32.mrb[11].mxu1  ;;  %v1182_v36 = vpop.eup %1181 }
 0x293   : > { %v691_v35 = vadd.f32 %v690_v34, %v590_v31  ;;  %v1184_v37 = vpop.eup %1183 }
 0x294   : > { %1193 = vtanh.f32 %v689_v33  ;;  %v933_v33 = vsub.s32 %v930_v24, %v1437_v26 }
 0x295   : > { %1195 = vtanh.f32 %v691_v35 }
 0x296   : > { %v1186_v38 = vpop.eup %1185 }
 0x297   : > { %v1188_v39 = vpop.eup %1187  ;;  %v1082_v40 = vpack.c.bf16 %v1186_v38, %v1182_v36 }
 0x298   : > { %v1080_v41 = vpack.c.bf16 %v1188_v39, %v1184_v37 }
 0x29a   : > { %1081 = vmatprep.subr.bf16.mxu0 %v1080_v41  ;;  %v1190_v42 = vpop.eup %1189 }
 0x29b   : > { %1083 = vmatpush1.bf16.msra.mxu0 %v1082_v40  ;;  %v1192_v43 = vpop.eup %1191 }
 0x29e   : > { %v1194_v44 = vpop.eup %1193 }
 0x29f   : > { %v1196_v45 = vpop.eup %1195  ;;  %v1086_v46 = vpack.c.bf16 %v1194_v44, %v1190_v42 }
 0x2a0   : > { %v1084_v47 = vpack.c.bf16 %v1196_v45, %v1192_v43 }
 0x2a2   : > { %1085 = vmatprep.subr.bf16.mxu0 %v1084_v47 }
 0x2a3   : > { %1087 = vmatpush1.bf16.msra.mxu0 %v1086_v46 }
 0x2a6   : > { %1053 = vmatmul.mubr.msk.f32.vlgmr.msra.gmra.mrb[4].mxu0 %vm452_vm0, %v1045_v48 }
 0x2a7   : > { %813 = vmatprep.mubr.f32.mxu0 %v1279_v23 }
 0x2aa   : > { %1054 = vmatmul.mubr.msk.f32.gmra.mrb[6].mxu0 %vm452_vm0, %v1046_v49 }
 0x2ab   : > { %819 = vmatprep.mubr.f32.mxu0 %v1279_v23 }
 0x2ae   : > { %1055 = vmatmul.mubr.msk.f32.gmra.mrb[8].mxu0 %vm452_vm0, %v1047_v50 }
 0x2af   : > { %825 = vmatprep.mubr.f32.mxu0 %v1279_v23  ;;  %v724_v23 = vpop.permute.xlu0 %723 }
 0x2b2   : > { %1056 = vmatmul.mubr.msk.f32.gmra.mrb[10].mxu0 %vm452_vm0, %v1048_v51 }
 0x2b3   : > { %v845_v22 = vpop.permute.xlu0 %844 }
 0x2b4   : > { %v850_v27 = vrot.slane %v845_v22, %v1443_v29 }
 0x379   : > { %v809_v53 = vpop.f32.mrb[4].mxu0 }
 0x37a   : > { %v810_v54 = vadd.f32 %v809_v53, %v714_v52  ;;  %v811_v55 = vpop.f32.mrb[5].mxu0 }
 0x37b   : > { %v812_v56 = vadd.f32 %v811_v55, %v714_v52 }
 0x37c   : > { %1197 = vtanh.f32 %v810_v54 }
 0x37d   : > { %v815_v58 = vpop.f32.mrb[6].mxu0  ;;  %1199 = vtanh.f32 %v812_v56 }
 0x37e   : > { %v816_v59 = vadd.f32 %v815_v58, %v719_v57  ;;  %v817_v60 = vpop.f32.mrb[7].mxu0 }
 0x37f   : > { %v818_v61 = vadd.f32 %v817_v60, %v719_v57 }
 0x380   : > { %1201 = vtanh.f32 %v816_v59 }
 0x381   : > { %1203 = vtanh.f32 %v818_v61  ;;  %v821_v62 = vpop.f32.mrb[8].mxu0 }
 0x382   : > { %v822_v63 = vadd.f32 %v821_v62, %v724_v23  ;;  %v823_v0 = vpop.f32.mrb[9].mxu0 }
 0x383   : > { %v824_v1 = vadd.f32 %v823_v0, %v724_v23 }
 0x384   : > { %1205 = vtanh.f32 %v822_v63 }
 0x385   : > { %v827_v3 = vpop.f32.mrb[10].mxu0  ;;  %1207 = vtanh.f32 %v824_v1 }
 0x386   : > { %v828_v4 = vadd.f32 %v827_v3, %v729_v2  ;;  %v829_v5 = vpop.f32.mrb[11].mxu0  ;;  %v1198_v7 = vpop.eup %1197 }
 0x387   : > { %v830_v6 = vadd.f32 %v829_v5, %v729_v2  ;;  %v1200_v8 = vpop.eup %1199 }
 0x388   : > { %1209 = vtanh.f32 %v828_v4 }
 0x389   : > { %1211 = vtanh.f32 %v830_v6 }
 0x38a   : > { %v1202_v9 = vpop.eup %1201 }
 0x38b   : > { %v1204_v10 = vpop.eup %1203  ;;  %v1090_v11 = vpack.c.bf16 %v1202_v9, %v1198_v7 }
 0x38c   : > { %v1088_v12 = vpack.c.bf16 %v1204_v10, %v1200_v8 }
 0x38e   : > { %1089 = vmatprep.subr.bf16.mxu1 %v1088_v12  ;;  %v1206_v13 = vpop.eup %1205 }
 0x38f   : > { %1091 = vmatpush1.bf16.msra.mxu1 %v1090_v11  ;;  %v1208_v14 = vpop.eup %1207 }
 0x392   : > { %v1210_v15 = vpop.eup %1209 }
 0x393   : > { %v1212_v16 = vpop.eup %1211  ;;  %v1094_v17 = vpack.c.bf16 %v1210_v15, %v1206_v13 }
 0x394   : > { %v1092_v18 = vpack.c.bf16 %v1212_v16, %v1208_v14 }
 0x396   : > { %1093 = vmatprep.subr.bf16.mxu1 %v1092_v18 }
 0x397   : > { %1095 = vmatpush1.bf16.msra.mxu1 %v1094_v17 }
 0x39a   : > { %1057 = vmatmul.mubr.msk.f32.vlgmr.msra.gmra.mrb[12].mxu1 %vm452_vm0, %v840_v19 }
 0x46d   : > { %v920_v28 = vpop.f32.mrb[12].mxu1 }
 0x46e   : > { %v921_v30 = vadd.f32 %v920_v28, %v850_v27  ;;  %v922_v31 = vpop.f32.mrb[13].mxu1 }
 0x46f   : > { %v923_v32 = vadd.f32 %v922_v31, %v850_v27 }
 0x471   : > { %v927_v34 = vcombine.low %v921_v30, %v923_v32 }
 0x473   : > { %v934_v35 = vrot.slane %v927_v34, %v933_v33 }
 0x475   : > { %v941_v36 = vrot.slane %v934_v35, %v933_v33 }
 0x477   : > { %947 = vst.msk [vmem:[%s274_s10] sm:$0x3] %vm945_vm1, %v941_v36 }
 0x478   : > { %1226 = shalt.err (!%p1223_p3)
}
 0x479   : > { %s1227_s22 = scalar_lea.hbm %s1522_s17, 32  ;;  %s1231_s25 = scalar_lea.hbm %s1571_s7, 64 }
 0x47a   : > { %p1228_p4 = scmp.ne.s32.totalorder %s1522_s17, %s1227_s22  ;;  %p1232_p9 = scmp.lt.u32.totalorder %s1522_s17, %s1571_s7 }
 0x47b   : > { %p1233_p10 = scmp.lt.u32.totalorder %s1231_s25, %s1227_s22  ;;  %p1235_p12 = scmp.lt.u32.totalorder %s1227_s22, %s1522_s17 }
 0x47c   : > { %p1229_p7 = pnand %p1228_p4, %p1363_p5 }
 0x47d   : > { %p1234_p11 = por %p1233_p10, %p1232_p9 }
 0x47e   : > { %p1230_p8 = pneg %p1229_p7 }
 0x47f   : > { %p1236_p13 = por %p1235_p12, %p1234_p11 }
 0x481   : > { %p1237_p0 = pnand %p1236_p13, %p1230_p8 }
 0x483   : > { %1240 = shalt.err (!%p1237_p0)
}
 0x484   : > { %1100 = dma.vmem_to_hbm [thread:$0]  (%p1363_p5), %s1524_s14, 32, %s1522_s17, %s949_s18  }
 0x485 PF: > { %p1106_p1 = scmp.ge.s32.totalorder %s1275_s29, 2  ;;  %s975_s10 = sand.u32 1, %s1263_s26  }
 0x486   : > { %s976_s15 = scalar_lea.sflag [#allocation4], %s975_s10 }
 0x487   : > { %p1103_p2 = pnand %p1106_p1, %p1367_p6 }
 0x489   : > { %1258 = dma.done.wait (!%p1103_p2), %s976_s15, 32  }
 0x48a   : > { %1260 = vsyncadd (!%p1103_p2), %s976_s15, 4294967264  ;;  %p19_p3 = scmp.ge.s32.totalorder %s1350_s8, 4   ;;  %s1574_s26 = smov %s1267_s27 }
 0x48b   : > { %s1575_s27 = smov %s1271_s28  ;;  %s1576_s28 = smov %s1361_s11 }
 0x48c   : > { %s1577_s29 = smov %s1350_s8  ;;  %21 = sbr.rel (!%p19_p3) target bundleno = 6 (0x6), region = 87 }
 0x493   :  { %981 = vsyncpa [#allocation4], 1 }
 0x494   :  { %983 = vsyncpa [#allocation4 + $0x1], 1 }

</bundles_post_ra>
